<compile_context>
chip_gen: v7x
topology: tpu7x:2x2x1
jax: 0.10.0
libtpu: 0.0.40
codegen_flags: <defaults>
</compile_context>

<pallas_src>
import jax
import jax.numpy as jnp
from jax.experimental import pallas as pl
from jax.experimental.pallas import tpu as pltpu

IN_DIM = 81
HID_DIM = 128
OUT_DIM = 81
PAD = 128  # lane-dense padded output / fc2 width


def _round_up(n, m):
    return ((n + m - 1) // m) * m


def simple_nn_kernel(x_ref, w1_ref, b1_ref, w2_ref, b2_ref, o_ref):
    # x_ref : (TB, 81)   f32   (raw input rows, cast to bf16 in VMEM)
    # w1_ref: (81, 128)  bf16
    # b1_ref: (1, 128)   f32
    # w2_ref: (128, 128) bf16  (cols 81.. are zero)
    # b2_ref: (1, 128)   f32   (cols 81.. are zero)
    # o_ref : (TB, 128)  f32   (cols 81.. are sliced off outside the kernel)
    x = x_ref[...].astype(jnp.bfloat16)   # VPU cast, straight to the MXU

    # fc1 + ReLU (bf16 MXU, f32 accumulate, f32 epilogue)
    h = jnp.dot(x, w1_ref[...], preferred_element_type=jnp.float32) + b1_ref[...]
    h = jnp.maximum(h, 0.0)

    # fc2 (hidden cast back to bf16 for the native MXU path)
    y = jnp.dot(h.astype(jnp.bfloat16), w2_ref[...],
                preferred_element_type=jnp.float32) + b2_ref[...]

    o_ref[...] = y


def prepare_params(w1, b1, w2, b2):
    """One-time layout prep: pad fc2 to 128 lanes, cast weights to bf16.

    w1: (81, 128), b1: (1, 128), w2: (128, 81), b2: (1, 81) — weights stored
    pre-transposed as (in, out) so the kernel computes y = x @ W + b.
    """
    w1b = w1.astype(jnp.bfloat16)                           # (81, 128)
    b1f = b1.reshape(1, HID_DIM).astype(jnp.float32)        # (1, 128)
    w2p = jnp.zeros((HID_DIM, PAD), jnp.bfloat16)
    w2p = w2p.at[:, :OUT_DIM].set(w2.astype(jnp.bfloat16))  # (128, 128)
    b2p = jnp.zeros((1, PAD), jnp.float32)
    b2p = b2p.at[:, :OUT_DIM].set(b2.reshape(1, OUT_DIM).astype(jnp.float32))
    return w1b, b1f, w2p, b2p


def _choose_tb(B, tb_max):
    if B <= 16:
        # Single (or tiny) block equal to the full batch dim — the
        # "block == full dim" clause of the (8,128) rule applies.
        return B
    # >= 2 grid steps so both v7x TensorCores participate; multiple of 8 for
    # f32 sublane packing; capped at tb_max to amortize per-step overhead
    # without blowing up the boundary tile.
    return min(tb_max, _round_up(pl.cdiv(B, 2), 8))


def simple_nn_forward(x, params, *, tb=2048):
    """x: (B, 81) f32; params = prepare_params(...). Returns (B, 81) f32."""
    w1b, b1f, w2p, b2p = params
    B = x.shape[0]
    TB = _choose_tb(B, tb)
    n_tiles = pl.cdiv(B, TB)

    cost = pl.CostEstimate(
        flops=2 * B * (IN_DIM * HID_DIM + HID_DIM * PAD),
        transcendentals=0,
        bytes_accessed=(B * IN_DIM * 4 + B * PAD * 4          # x in, out f32
                        + w1b.size * 2 + w2p.size * 2         # bf16 weights
                        + b1f.size * 4 + b2p.size * 4),       # f32 biases
    )

    out_pad = pl.pallas_call(
        simple_nn_kernel,
        out_shape=jax.ShapeDtypeStruct((B, PAD), jnp.float32),
        grid_spec=pltpu.PrefetchScalarGridSpec(
            num_scalar_prefetch=0,
            grid=(n_tiles,),
            in_specs=[
                pl.BlockSpec((TB, IN_DIM), lambda i: (i, 0)),     # x: batch-tiled
                pl.BlockSpec((IN_DIM, HID_DIM), lambda i: (0, 0)),  # w1: resident
                pl.BlockSpec((1, HID_DIM), lambda i: (0, 0)),     # b1: resident
                pl.BlockSpec((HID_DIM, PAD), lambda i: (0, 0)),   # w2: resident
                pl.BlockSpec((1, PAD), lambda i: (0, 0)),         # b2: resident
            ],
            out_specs=pl.BlockSpec((TB, PAD), lambda i: (i, 0)),
        ),
        compiler_params=pltpu.CompilerParams(
            dimension_semantics=("parallel",),
        ),
        cost_estimate=cost,
    )(x, w1b, b1f, w2p, b2p)

    # Only the padded columns are sliced off (rows are exact).
    return out_pad[:, :OUT_DIM]


def init_params(key):
    """Deterministic init matching nn.Linear fan-in bounds.

    PyTorch nn.Linear stores weight as (out, in); we store the transpose
    (in, out) so the kernel does x @ W without an in-kernel transpose.
    """
    k1, k2, k3, k4 = jax.random.split(key, 4)
    bound1 = 1.0 / jnp.sqrt(IN_DIM)
    bound2 = 1.0 / jnp.sqrt(HID_DIM)
    w1 = jax.random.uniform(k1, (IN_DIM, HID_DIM), jnp.float32, -bound1, bound1)
    b1 = jax.random.uniform(k2, (1, HID_DIM), jnp.float32, -bound1, bound1)
    w2 = jax.random.uniform(k3, (HID_DIM, OUT_DIM), jnp.float32, -bound2, bound2)
    b2 = jax.random.uniform(k4, (1, OUT_DIM), jnp.float32, -bound2, bound2)
    return w1, b1, w2, b2


if __name__ == "__main__":
    key = jax.random.PRNGKey(0)
    kx, kp = jax.random.split(key)
    B = 8
    x = jax.random.normal(kx, (B, IN_DIM), jnp.float32)
    w1, b1, w2, b2 = init_params(kp)

    params = prepare_params(w1, b1, w2, b2)   # one-time layout prep
    out = simple_nn_forward(x, params)
    out = jax.block_until_ready(out)

    # Pure-JAX reference mirroring the kernel's bf16-operand / f32-accumulate
    # path.  (Differs from a pure-f32 PyTorch SimpleNN by ~1e-2 relative.)
    xb = x.astype(jnp.bfloat16)
    w1b = w1.astype(jnp.bfloat16)
    w2b = w2.astype(jnp.bfloat16)
    h_ref = jnp.maximum(
        jnp.dot(xb, w1b, preferred_element_type=jnp.float32) + b1, 0.0)
    ref = jnp.dot(h_ref.astype(jnp.bfloat16), w2b,
                  preferred_element_type=jnp.float32) + b2

    assert out.shape == (B, OUT_DIM)
    assert jnp.allclose(out, ref, atol=2e-2, rtol=2e-2), (
        float(jnp.max(jnp.abs(out - ref))))

    print("KERNEL_OK")
</pallas_src>

<mosaic_0001>
module attributes {stable_mosaic.version = 11 : i64} {
  func.func @simple_nn_kernel(%arg0: i32, %arg1: memref<8x81xf32, #tpu.memory_space<vmem>>, %arg2: memref<81x128xbf16, #tpu.memory_space<vmem>>, %arg3: memref<1x128xf32, #tpu.memory_space<vmem>>, %arg4: memref<128x128xbf16, #tpu.memory_space<vmem>>, %arg5: memref<1x128xf32, #tpu.memory_space<vmem>>, %arg6: memref<8x128xf32, #tpu.memory_space<vmem>>) attributes {dimension_semantics = [#tpu.dimension_semantics<parallel>], iteration_bounds = array<i64: 1>, scalar_prefetch = 0 : i64, scratch_operands = 0 : i64, tpu.core_type = #tpu.core_type<tc>, window_params = [{transform_indices = @transform_0, window_bounds = array<i64: 8, 81>}, {pipeline_mode = #tpu.pipeline_mode<synchronous>, transform_indices = @transform_1, window_bounds = array<i64: 81, 128>}, {pipeline_mode = #tpu.pipeline_mode<synchronous>, transform_indices = @transform_2, window_bounds = array<i64: 1, 128>}, {pipeline_mode = #tpu.pipeline_mode<synchronous>, transform_indices = @transform_3, window_bounds = array<i64: 128, 128>}, {pipeline_mode = #tpu.pipeline_mode<synchronous>, transform_indices = @transform_4, window_bounds = array<i64: 1, 128>}, {transform_indices = @transform_5, window_bounds = array<i64: 8, 128>}]} {
    %c0 = arith.constant 0 : index
    %c0_0 = arith.constant 0 : index
    %0 = vector.load %arg1[%c0, %c0_0] : memref<8x81xf32, #tpu.memory_space<vmem>>, vector<8x81xf32>
    %1 = arith.truncf %0 : vector<8x81xf32> to vector<8x81xbf16>
    %c0_1 = arith.constant 0 : index
    %c0_2 = arith.constant 0 : index
    %2 = vector.load %arg2[%c0_1, %c0_2] : memref<81x128xbf16, #tpu.memory_space<vmem>>, vector<81x128xbf16>
    %cst = arith.constant dense<0.000000e+00> : vector<8x128xf32>
    %3 = tpu.matmul %1, %2, %cst {dimension_numbers = #tpu.dot_dimension_numbers<[1], [0], [0], [1], [0, 0, 1, 1], [], []>} : vector<8x81xbf16>, vector<81x128xbf16>, vector<8x128xf32> -> vector<8x128xf32>
    %c0_3 = arith.constant 0 : index
    %c0_4 = arith.constant 0 : index
    %4 = vector.load %arg3[%c0_3, %c0_4] : memref<1x128xf32, #tpu.memory_space<vmem>>, vector<1x128xf32>
    %5 = vector.broadcast %4 : vector<1x128xf32> to vector<8x128xf32>
    %6 = arith.addf %3, %5 : vector<8x128xf32>
    %cst_5 = arith.constant 0.000000e+00 : f32
    %7 = vector.broadcast %cst_5 : f32 to vector<8x128xf32>
    %8 = arith.maximumf %6, %7 : vector<8x128xf32>
    %9 = arith.truncf %8 : vector<8x128xf32> to vector<8x128xbf16>
    %c0_6 = arith.constant 0 : index
    %c0_7 = arith.constant 0 : index
    %10 = vector.load %arg4[%c0_6, %c0_7] : memref<128x128xbf16, #tpu.memory_space<vmem>>, vector<128x128xbf16>
    %cst_8 = arith.constant dense<0.000000e+00> : vector<8x128xf32>
    %11 = tpu.matmul %9, %10, %cst_8 {dimension_numbers = #tpu.dot_dimension_numbers<[1], [0], [0], [1], [0, 0, 1, 1], [], []>} : vector<8x128xbf16>, vector<128x128xbf16>, vector<8x128xf32> -> vector<8x128xf32>
    %c0_9 = arith.constant 0 : index
    %c0_10 = arith.constant 0 : index
    %12 = vector.load %arg5[%c0_9, %c0_10] : memref<1x128xf32, #tpu.memory_space<vmem>>, vector<1x128xf32>
    %13 = vector.broadcast %12 : vector<1x128xf32> to vector<8x128xf32>
    %14 = arith.addf %11, %13 : vector<8x128xf32>
    %c0_11 = arith.constant 0 : index
    %c0_12 = arith.constant 0 : index
    %15 = vector.load %arg6[%c0_11, %c0_12] : memref<8x128xf32, #tpu.memory_space<vmem>>, vector<8x128xf32>
    tpu.vector_store %arg6[%c0_11, %c0_12], %14 {strides = array<i32>} : memref<8x128xf32, #tpu.memory_space<vmem>>, vector<8x128xf32>,
    return
  }
  func.func @transform_0(%arg0: i32) -> (i32, i32) {
    %c0_i32 = arith.constant 0 : i32
    %c0_i32_0 = arith.constant 0 : i32
    return %arg0, %c0_i32 : i32, i32
  }
  func.func @transform_1(%arg0: i32) -> (i32, i32) {
    %c0_i32 = arith.constant 0 : i32
    %c0_i32_0 = arith.constant 0 : i32
    %c0_i32_1 = arith.constant 0 : i32
    return %c0_i32, %c0_i32_0 : i32, i32
  }
  func.func @transform_2(%arg0: i32) -> (i32, i32) {
    %c0_i32 = arith.constant 0 : i32
    %c0_i32_0 = arith.constant 0 : i32
    %c0_i32_1 = arith.constant 0 : i32
    return %c0_i32, %c0_i32_0 : i32, i32
  }
  func.func @transform_3(%arg0: i32) -> (i32, i32) {
    %c0_i32 = arith.constant 0 : i32
    %c0_i32_0 = arith.constant 0 : i32
    %c0_i32_1 = arith.constant 0 : i32
    return %c0_i32, %c0_i32_0 : i32, i32
  }
  func.func @transform_4(%arg0: i32) -> (i32, i32) {
    %c0_i32 = arith.constant 0 : i32
    %c0_i32_0 = arith.constant 0 : i32
    %c0_i32_1 = arith.constant 0 : i32
    return %c0_i32, %c0_i32_0 : i32, i32
  }
  func.func @transform_5(%arg0: i32) -> (i32, i32) {
    %c0_i32 = arith.constant 0 : i32
    %c0_i32_0 = arith.constant 0 : i32
    return %arg0, %c0_i32 : i32, i32
  }
}

</mosaic_0001>

<bundles_post_ra>
// kernel: tpu_custom_call.1
= control target key start
LH: loop header
LB: loop body
LE: loop exit
PB: predicated region body
PF: predicated region fallthrough
CT: control target
= control target key end

     0   :  { %10 = vsyncpa [#allocation3], 0  ;;  %s579_s0 = inlined_call_operand.hbm [shape: f32[8,81], index: 0, kind: input, shape index: {}]   ;;  %s580_s1 = inlined_call_operand.hbm [shape: bf16[81,128], index: 1, kind: input, shape index: {}]   ;;  %s581_s2 = inlined_call_operand.vmem [shape: f32[1,128], index: 2, kind: input, shape index: {}]   ;;  %s582_s3 = inlined_call_operand.hbm [shape: bf16[128,128], index: 3, kind: input, shape index: {}]   ;;  %s583_s4 = inlined_call_operand.vmem [shape: f32[1,128], index: 4, kind: input, shape index: {}]   ;;  %s584_s5 = inlined_call_operand.hbm [shape: f32[8,128], index: 5, kind: output, shape index: {}]  }
   0x1   :  { %11 = vsyncpa [#allocation6], 0 }
   0x2   :  { %12 = vsyncpa [#allocation4], 0  ;;  %s480_s18 = smov [#allocation5]   ;;  %s386_s22 = scalar_lea.hbm %s580_s1, 704 }
   0x3   :  { %s28_s19 = sshll.u32 %s480_s18, 4  ;;  %p387_p0 = scmp.ne.s32.totalorder %s580_s1, %s386_s22  ;;  %s29_s19 = int_to_ptr.vmem [resolvable:$true] %s28_s19 }
   0x4   :  { %p390_p1 = scmp.lt.u32.totalorder %s386_s22, %s580_s1 }
   0x6   :  { %p392_p2 = pnand %p390_p1, %p387_p0 }
   0x8   :  { %395 = shalt.err (!%p392_p2)
}
   0x9   :  { %s396_s27 = scalar_lea.vmem %s29_s19, 704  ;;  %p401_p4 = scmp.lt.s32.totalorder %s29_s19, %s29_s19 }
   0xa   :  { %p397_p3 = scmp.ne.s32.totalorder %s29_s19, %s396_s27  ;;  %p402_p5 = scmp.lt.s32.totalorder %s396_s27, %s396_s27 }
   0xc   :  { %p403_p6 = por %p402_p5, %p401_p4 }
   0xe   :  { %p404_p7 = pnand %p403_p6, %p397_p3 }
  0x10   :  { %407 = shalt.err (!%p404_p7)
}
  0x11   :  { %s481_s28 = smov 64   ;;  %s482_s29 = smov 4  }
  0x12   :  { %34 = dma.hbm_to_vmem [thread:$0]  %s580_s1, 704, %s29_s19, [#allocation6], %s481_s28, %s481_s28, %s482_s29  }
  0x13   :  { %s483_s7 = smov [#allocation2]   ;;  %s484_s9 = smov [#allocation7]  }
  0x14   :  { %s19_s8 = sshll.u32 %s483_s7, 4  ;;  %s42_s10 = sshll.u32 %s484_s9, 4  ;;  %s20_s8 = int_to_ptr.vmem [resolvable:$true] %s19_s8  ;;  %s43_s10 = int_to_ptr.vmem [resolvable:$true] %s42_s10 }
  0x15   :  { %s408_s13 = scalar_lea.hbm %s579_s0, 128 }
  0x16   :  { %p409_p8 = scmp.ne.s32.totalorder %s579_s0, %s408_s13  ;;  %p412_p9 = scmp.lt.u32.totalorder %s408_s13, %s579_s0 }
  0x18   :  { %p414_p10 = pnand %p412_p9, %p409_p8 }
  0x1a   :  { %417 = shalt.err (!%p414_p10)
}
  0x1b   :  { %s418_s1 = scalar_lea.vmem %s20_s8, 128  ;;  %p423_p12 = scmp.lt.s32.totalorder %s20_s8, %s20_s8 }
  0x1c   :  { %p419_p11 = scmp.ne.s32.totalorder %s20_s8, %s418_s1  ;;  %p424_p13 = scmp.lt.s32.totalorder %s418_s1, %s418_s1 }
  0x1e   :  { %p425_p0 = por %p424_p13, %p423_p12 }
  0x20   :  { %p426_p1 = pnand %p425_p0, %p419_p11 }
  0x22   :  { %429 = shalt.err (!%p426_p1)
}
  0x23   :  { %22 = dma.hbm_to_vmem [thread:$0]  %s579_s0, 128, %s20_s8, [#allocation3]  }
  0x24   :  { %s430_s22 = scalar_lea.hbm %s582_s3, 1024 }
  0x25   :  { %p431_p2 = scmp.ne.s32.totalorder %s582_s3, %s430_s22  ;;  %p434_p3 = scmp.lt.u32.totalorder %s430_s22, %s582_s3 }
  0x27   :  { %p436_p4 = pnand %p434_p3, %p431_p2 }
  0x29   :  { %439 = shalt.err (!%p436_p4)
}
  0x2a   :  { %s440_s27 = scalar_lea.vmem %s43_s10, 1024  ;;  %p445_p6 = scmp.lt.s32.totalorder %s43_s10, %s43_s10 }
  0x2b   :  { %p441_p5 = scmp.ne.s32.totalorder %s43_s10, %s440_s27  ;;  %p446_p7 = scmp.lt.s32.totalorder %s440_s27, %s440_s27 }
  0x2d   :  { %p447_p8 = por %p446_p7, %p445_p6 }
  0x2f   :  { %p448_p9 = pnand %p447_p8, %p441_p5 }
  0x31   :  { %451 = shalt.err (!%p448_p9)
}
  0x32   :  { %48 = dma.hbm_to_vmem [thread:$0]  %s582_s3, 1024, %s43_s10, [#allocation6], %s481_s28, %s481_s28, %s482_s29  }
  0x33   :  { %474 = dma.done.wait [#allocation3], 128  }
  0x34   :  { %475 = vsyncadd [#allocation3], 4294967168 }
  0x35   :  { %476 = dma.done.wait [#allocation6], 1728  }
  0x36   :  { %477 = vsyncadd [#allocation6], 4294965568  ;;  %v485_v0 = vmov 0.0   ;;  %vm486_vm0 = vmmov 0   ;;  %v372_v1 = vld [vmem:[#allocation5] sm:$0xff]   ;;  %v373_v2 = vld [vmem:[#allocation5 + $0x8] sm:$0xff]  }
  0x37   :  { %327 = vmatprep.subr.bf16.mxu0 %v485_v0  ;;  %339 = vmatprep.mubr.msk.bf16.mxu0 %vm486_vm0, %v485_v0  ;;  %v374_v3 = vld [vmem:[#allocation5 + $0x10] sm:$0xff]   ;;  %v375_v6 = vld [vmem:[#allocation5 + $0x18] sm:$0xff]   ;;  %vm118_vm1 = vcmask 1040384   ;;  %v376_v8 = vld [vmem:[#allocation5 + $0x20] sm:$0xff]   ;;  %v487_v10 = vmov 0   ;;  %vm114_vm2 = vcmask 662528  }
  0x38   :  { %343 = vmatprep.subr.bf16.mxu1 %v485_v0  ;;  %359 = vmatprep.mubr.msk.bf16.mxu1 %vm486_vm0, %v485_v0  ;;  %v378_v4 = vld [vmem:[#allocation7] sm:$0xff]   ;;  %v379_v5 = vld [vmem:[#allocation7 + $0x8] sm:$0xff]   ;;  %v380_v7 = vld [vmem:[#allocation7 + $0x10] sm:$0xff]   ;;  %v120_v11 = vsel %vm118_vm1, 65535, %v487_v10  ;;  %s488_s7 = smov [#allocation8]  }
  0x39   :  { %328 = vmatpush3.bf16.msra.mxu0 %v372_v1  ;;  %344 = vmatpush3.bf16.msra.mxu1 %v378_v4  ;;  %v377_v9 = vld [vmem:[#allocation5 + $0x28] ss:$0 sps:$4 sm:$0x11]   ;;  %v61_v14 = vld [vmem:[#allocation2] sm:$0xff]  ;;  %v382_v15 = vld [vmem:[#allocation7 + $0x20] sm:$0xff]   ;;  %s284_s8 = sshll.u32 %s488_s7, 4  ;;  %s285_s8 = int_to_ptr.vmem [resolvable:$true] %s284_s8 }
  0x3a   :  { %329 = vmatprep.subr.bf16.mxu0 %v485_v0  ;;  %345 = vmatprep.subr.bf16.mxu1 %v485_v0  ;;  %v381_v12 = vld [vmem:[#allocation7 + $0x18] sm:$0xff]   ;;  %v122_v13 = vand.u32 %v377_v9, %v120_v11  ;;  %v62_v16 = vpack.c.bf16 %v61_v14, %v61_v14  ;;  %v383_v17 = vld [vmem:[#allocation7 + $0x28] sm:$0xff]   ;;  %v384_v18 = vld [vmem:[#allocation7 + $0x30] sm:$0xff]   ;;  %p457_p11 = scmp.lt.s32.totalorder %s285_s8, %s285_s8 }
  0x3b   :  { %v385_v19 = vld [vmem:[#allocation7 + $0x38] sm:$0xff]   ;;  %v294_v20 = vld [vmem:[%s581_s2] ss:$0 sm:$0xff]  ;;  %s452_s2 = scalar_lea.vmem %s285_s8, 128 }
  0x3c   :  { %v302_v28 = vld [vmem:[%s583_s4] ss:$0 sm:$0xff]  ;;  %p453_p10 = scmp.ne.s32.totalorder %s285_s8, %s452_s2  ;;  %p458_p12 = scmp.lt.s32.totalorder %s452_s2, %s452_s2 }
  0x3d   :  { %330 = vmatpush3.bf16.msra.mxu0 %v373_v2  ;;  %346 = vmatpush3.bf16.msra.mxu1 %v379_v5 }
  0x3e   :  { %331 = vmatprep.subr.bf16.mxu0 %v485_v0  ;;  %347 = vmatprep.subr.bf16.mxu1 %v485_v0  ;;  %p459_p13 = por %p458_p12, %p457_p11 }
  0x40   :  { %p460_p0 = pnand %p459_p13, %p453_p10 }
  0x41   :  { %332 = vmatpush3.bf16.msra.mxu0 %v374_v3  ;;  %348 = vmatpush3.bf16.msra.mxu1 %v380_v7 }
  0x42   :  { %333 = vmatprep.subr.bf16.mxu0 %v485_v0  ;;  %349 = vmatprep.subr.bf16.mxu1 %v485_v0 }
  0x45   :  { %334 = vmatpush3.bf16.msra.mxu0 %v375_v6  ;;  %350 = vmatpush3.bf16.msra.mxu1 %v381_v12 }
  0x46   :  { %335 = vmatprep.subr.bf16.mxu0 %v485_v0  ;;  %351 = vmatprep.subr.bf16.mxu1 %v485_v0 }
  0x49   :  { %336 = vmatpush3.bf16.msra.mxu0 %v376_v8  ;;  %352 = vmatpush3.bf16.msra.mxu1 %v382_v15 }
  0x4a   :  { %337 = vmatprep.subr.bf16.mxu0 %v485_v0  ;;  %353 = vmatprep.subr.bf16.mxu1 %v485_v0 }
  0x4d   :  { %338 = vmatpush3.bf16.msra.mxu0 %v122_v13  ;;  %354 = vmatpush3.bf16.msra.mxu1 %v383_v17 }
  0x4e   :  { %355 = vmatprep.subr.bf16.mxu1 %v485_v0 }
  0x50   :  { %340 = vmatmul.mubr.msk.bf16.vlgmr.msra.gmra.mrb[0].mxu0 %vm114_vm2, %v62_v16 }
  0x51   :  { %356 = vmatpush3.bf16.msra.mxu1 %v384_v18 }
  0x52   :  { %357 = vmatprep.subr.bf16.mxu1 %v485_v0 }
  0x55   :  { %358 = vmatpush3.bf16.msra.mxu1 %v385_v19 }
 0x123   :  { %v158_v21 = vpop.f32.mrb[0].mxu0 }
 0x124   :  { %v159_v22 = vadd.f32 %v294_v20, %v158_v21  ;;  %v341_v23 = vpop.f32.mrb[1].mxu0 }
 0x125   :  { %v161_v24 = vpop.f32.mrb[2].mxu0 }
 0x126   :  { %v164_v25 = vmax.f32 %v159_v22, 0.0  ;;  %v342_v26 = vpop.f32.mrb[3].mxu0 }
 0x128   :  { %v165_v27 = vpack.c.bf16 %v164_v25, %v164_v25 }
 0x12a   :  { %360 = vmatmul.mubr.bf16.vlgmr.msra.gmra.mrb[0].mxu1 %v165_v27 }
 0x1fd   :  { %v271_v29 = vpop.f32.mrb[0].mxu1 }
 0x1fe   :  { %v272_v30 = vadd.f32 %v302_v28, %v271_v29  ;;  %v361_v31 = vpop.f32.mrb[1].mxu1 }
 0x1ff   :  { %v274_v32 = vpop.f32.mrb[2].mxu1 }
 0x200   :  { %277 = vst [vmem:[#allocation8] sm:$0xff] %v272_v30  ;;  %v362_v33 = vpop.f32.mrb[3].mxu1 }
 0x201   :  { %463 = shalt.err (!%p460_p0)
}
 0x202   :  { %s464_s4 = scalar_lea.hbm %s584_s5, 128 }
 0x203   :  { %p465_p1 = scmp.ne.s32.totalorder %s584_s5, %s464_s4  ;;  %p468_p2 = scmp.lt.u32.totalorder %s464_s4, %s584_s5 }
 0x205   :  { %p470_p3 = pnand %p468_p2, %p465_p1 }
 0x207   :  { %473 = shalt.err (!%p470_p3)
}
 0x208   :  { %287 = dma.vmem_to_hbm [thread:$0]  %s285_s8, 128, %s584_s5, [#allocation4]  }
 0x209   :  { %478 = dma.done.wait [#allocation4], 128  }
 0x20a   :  { %479 = vsyncadd [#allocation4], 4294967168 }
 0x20b   :  { %291 = vsyncpa [#allocation3], 1 }
 0x20c   :  { %292 = vsyncpa [#allocation6], 1 }
 0x20d   :  { %293 = vsyncpa [#allocation4], 1 }

</bundles_post_ra>
